<compile_context>
chip_gen: v5e
topology: v5e:2x2
jax: 0.10.0
libtpu: 0.0.40
codegen_flags: <defaults>
</compile_context>

<pallas_src>
import numpy as np
import jax
import jax.numpy as jnp
from jax import lax
from jax.experimental import pallas as pl
from jax.experimental.pallas import tpu as pltpu  # noqa: F401  (kept for TPU-specific tuning hooks)

# ----- synthetic config (small, consistent with the module's docstring / GNM) -----
B = 2
H = W = 4                     # img_enc: (bs, dim, 4, 4)
IMG_ENC_DIM = 32
PWDW_FILTERS = (64, 64)       # args.arch.pwdw.pwdw_filters
PWDW_GROUPS = (8, 8)          # args.arch.pwdw.pwdw_groups (GroupNorm groups)
Z_PRES = 1                    # args.z.z_pres_dim
Z_WHERE = 4                   # args.z.z_where_dim
Z_DEPTH = 1                   # args.z.z_depth_dim
Z_WHAT = 16                   # args.z.z_what_dim
PRES_LOGIT_SCALE = 8.8        # args.const.pres_logit_scale
GN_EPS = 1e-5                 # PyTorch GroupNorm default eps

CIN = IMG_ENC_DIM
F1, F2 = PWDW_FILTERS
assert F1 == F2 and PWDW_GROUPS[0] == PWDW_GROUPS[1]
N_GROUPS = PWDW_GROUPS[0]
CG = F1 // N_GROUPS
N_PIX = H * W                 # spatial positions per sample
BN = B * N_PIX                # rows processed by the single program
GN_INV_CNT = 1.0 / float(N_PIX * CG)

# --------- packed head channel layout (order must match PyTorch chunk(2, 1)) --------
HEAD_DIM = Z_PRES + 2 * Z_WHERE + 2 * Z_DEPTH + 2 * Z_WHAT      # 43
OUT_PAD = 128                                                   # lane-dense output slab
C_PRES0, C_PRES1 = 0, Z_PRES
C_WMEAN0, C_WMEAN1 = C_PRES1, C_PRES1 + Z_WHERE
C_WSTD0, C_WSTD1 = C_WMEAN1, C_WMEAN1 + Z_WHERE
C_DMEAN0, C_DMEAN1 = C_WSTD1, C_WSTD1 + Z_DEPTH
C_DSTD0, C_DSTD1 = C_DMEAN1, C_DMEAN1 + Z_DEPTH
C_QMEAN0, C_QMEAN1 = C_DSTD1, C_DSTD1 + Z_WHAT
C_QSTD0, C_QSTD1 = C_QMEAN1, C_QMEAN1 + Z_WHAT
assert C_QSTD1 == HEAD_DIM
HEAD_SLICES = [(C_PRES0, C_PRES1), (C_WMEAN0, C_WMEAN1), (C_WSTD0, C_WSTD1),
               (C_DMEAN0, C_DMEAN1), (C_DSTD0, C_DSTD1),
               (C_QMEAN0, C_QMEAN1), (C_QSTD0, C_QSTD1)]

# --------- packed parameter slab layouts (built once at pack time) ----------------
W_ROWS = CIN + F1 + F2                 # [w1 | folded w2 | folded fused head] rows
R_B1, R_B2, R_BH, R_TANH, R_SP = 0, 1, 2, 3, 4
R_MT = 8                               # rows [8 : 8+G)      -> MT  [G,  F1]
R_M = 16                               # rows [16 : 16+F1)   -> M   [F1, G ]
AUX_ROWS = R_M + F1                    # 80


# ---------------- in-kernel math helpers (traced inside the kernel) ----------------
def _celu(x):
    # CELU(alpha=1): x if x>0 else exp(x)-1; guard exp against overflow.
    return jnp.where(x > 0.0, x, jnp.exp(jnp.minimum(x, 0.0)) - 1.0)


def _softplus(x):
    # numerically stable softplus (log1p form is marginally more accurate; this
    # form is kept because it is the proven Mosaic-lowerable variant)
    return jnp.maximum(x, 0.0) + jnp.log(1.0 + jnp.exp(-jnp.abs(x)))


def _gn_one_sample(hb, M, MT):
    # hb: [N_PIX, F] one sample's spatial-flattened activations (channels-last).
    # nn.GroupNorm semantics: biased per-(sample, group) stats over spatial x
    # channels-in-group. The affine (gamma, beta) is folded into the NEXT matmul
    # at pack time, so only normalization happens here.
    s1 = jnp.sum(hb, axis=0, keepdims=True)
    s2 = jnp.sum(hb * hb, axis=0, keepdims=True)
    g = jnp.dot(jnp.concatenate([s1, s2], axis=0), M,
                preferred_element_type=jnp.float32) * GN_INV_CNT        # [2, G]
    mean = g[0:1, :]
    var = jnp.maximum(g[1:2, :] - mean * mean, 0.0)                      # clamp E[x^2]-m^2
    mv = jnp.dot(jnp.concatenate([mean, lax.rsqrt(var + GN_EPS)], axis=0), MT,
                 preferred_element_type=jnp.float32)                     # [2, F]
    return (hb - mv[0:1, :]) * mv[1:2, :]


def _group_norm_all(h, M, MT):
    # h: [B*N_PIX, F]; per-sample GroupNorm on static, sublane-aligned 16-row
    # slices (unrolled over B — B is tiny and static).
    parts = [_gn_one_sample(h[b * N_PIX:(b + 1) * N_PIX, :], M, MT) for b in range(B)]
    return jnp.concatenate(parts, axis=0)


# --------------------------------- the kernel --------------------------------------
def local_latent_decoder_kernel(x_ref, w_ref, aux_ref, out_ref):
    # Single program: whole [B*N, CIN] activation block, channels-last.
    x = x_ref[...]

    # merged weight slab: rows [0:CIN] w1, [CIN:CIN+F1] g1-folded w2,
    # [CIN+F1:CIN+F1+F2] g2-folded fused-head weight (lane-padded to 128).
    w1 = w_ref[0:CIN, 0:F1]
    w2 = w_ref[CIN:CIN + F1, 0:F2]
    wh = w_ref[CIN + F1:CIN + F1 + F2, :]

    # aux slab: biases, activation masks, GN one-hot matrices (all precomputed).
    b1 = aux_ref[R_B1:R_B1 + 1, 0:F1]
    b2 = aux_ref[R_B2:R_B2 + 1, 0:F2]
    bh = aux_ref[R_BH:R_BH + 1, :]
    tanh_mask = aux_ref[R_TANH:R_TANH + 1, :]                # 1.0 on pres lane
    sp_mask = aux_ref[R_SP:R_SP + 1, :]                      # 1.0 on std lanes
    MT = aux_ref[R_MT:R_MT + N_GROUPS, 0:F1]                 # [G, F]
    M = aux_ref[R_M:R_M + F1, 0:N_GROUPS]                    # [F, G]

    # pwdw_net: [conv1x1 -> CELU -> GroupNorm] x 2 (GN affine folded downstream)
    h = jnp.dot(x, w1, preferred_element_type=jnp.float32) + b1
    h = _group_norm_all(_celu(h), M, MT)
    h = jnp.dot(h, w2, preferred_element_type=jnp.float32) + b2
    h = _group_norm_all(_celu(h), M, MT)

    # fused heads: one MXU push into a lane-dense [B*N, 128] slab
    y = jnp.dot(h, wh, preferred_element_type=jnp.float32) + bh

    # per-lane activation selection via precomputed masks
    out_ref[...] = jnp.where(tanh_mask > 0.5, jnp.tanh(y) * PRES_LOGIT_SCALE,
                             jnp.where(sp_mask > 0.5, _softplus(y), y))


# ---------------------------------- packing -----------------------------------------
def pack_params(params):
    """Pack the 16 per-layer parameters into 2 lane-dense slabs (done once,
    off the hot path). GroupNorm affines are folded into the following matmul."""
    (w1, b1, g1, be1, w2, b2, g2, be2, wp, bp, ww, bw, wd, bd, wq, bq) = params

    # fold GN1 affine (g1, be1) into conv2:   gn_out @ w2 + b2
    #   = h_norm @ (diag(g1) @ w2) + (be1 @ w2 + b2)
    w2f = w2 * g1.reshape(F1, 1)
    b2f = b2 + be1 @ w2

    # fold GN2 affine (g2, be2) into the fused head matmul
    whc = jnp.concatenate([wp, ww, wd, wq], axis=1)                   # [F2, 43]
    bhc = jnp.concatenate([bp, bw, bd, bq], axis=1)                   # [1, 43]
    whf = whc * g2.reshape(F2, 1)
    bhf = bhc + be2 @ whc
    whf = jnp.pad(whf, ((0, 0), (0, OUT_PAD - HEAD_DIM)))             # [F2, 128]
    bhf = jnp.pad(bhf, ((0, 0), (0, OUT_PAD - HEAD_DIM)))             # [1, 128]

    def lane_pad(u):
        return jnp.pad(u, ((0, 0), (0, OUT_PAD - u.shape[1])))

    # one merged weight slab -> one input DMA
    w_slab = jnp.concatenate([lane_pad(w1), lane_pad(w2f), whf], axis=0)   # [160, 128]

    # activation-selection masks (precomputed; replaces in-kernel lane iota)
    tanh_mask = jnp.zeros((OUT_PAD,), jnp.float32).at[C_PRES0:C_PRES1].set(1.0)
    sp_mask = jnp.zeros((OUT_PAD,), jnp.float32)
    for lo, hi in ((C_WSTD0, C_WSTD1), (C_DSTD0, C_DSTD1), (C_QSTD0, C_QSTD1)):
        sp_mask = sp_mask.at[lo:hi].set(1.0)

    # GroupNorm one-hot group-membership matrices (precomputed)
    ch = jnp.arange(F1)
    M = (ch[:, None] // CG == jnp.arange(N_GROUPS)[None, :]).astype(jnp.float32)  # [F, G]
    MT = M.T                                                                       # [G, F]

    aux = jnp.zeros((AUX_ROWS, OUT_PAD), jnp.float32)
    aux = aux.at[R_B1, 0:F1].set(b1[0])
    aux = aux.at[R_B2, 0:F2].set(b2f[0])
    aux = aux.at[R_BH, :].set(bhf[0])
    aux = aux.at[R_TANH, :].set(tanh_mask)
    aux = aux.at[R_SP, :].set(sp_mask)
    aux = aux.at[R_MT:R_MT + N_GROUPS, 0:F1].set(MT)
    aux = aux.at[R_M:R_M + F1, 0:N_GROUPS].set(M)
    return w_slab, aux


# ---------------------------------- wrapper -----------------------------------------
def local_latent_decoder(img_enc_nchw, packed, channels_last=False):
    """img_enc_nchw: [B, C, H, W] (PyTorch layout). Returns list of 7 tensors:
    [q_pres_logits, q_where_mean, q_where_std, q_depth_mean, q_depth_std,
     q_what_mean, q_what_std]. Default NCHW to match the PyTorch module; pass
    channels_last=True to skip the lane-poor transpose+slice epilogue."""
    Bs, C, Hh, Ww = img_enc_nchw.shape
    assert (Bs, C, Hh, Ww) == (B, CIN, H, W)
    w_slab, aux = packed

    # single input transpose: NCHW -> [B*N, C] channels-last
    x2d = jnp.transpose(img_enc_nchw, (0, 2, 3, 1)).reshape(Bs * N_PIX, C)

    # No grid: the whole problem is one program / one set of whole-array VMEM
    # blocks (3 input DMAs + 1 lane-dense output DMA, no pipeline overhead).
    out = pl.pallas_call(
        local_latent_decoder_kernel,
        out_shape=jax.ShapeDtypeStruct((Bs * N_PIX, OUT_PAD), jnp.float32),
    )(x2d, w_slab, aux)

    y = out.reshape(Bs, Hh, Ww, OUT_PAD)
    if channels_last:
        return [y[..., lo:hi] for lo, hi in HEAD_SLICES]
    yt = jnp.transpose(y, (0, 3, 1, 2))                       # [B, 128, H, W]
    return [yt[:, lo:hi] for lo, hi in HEAD_SLICES]


# ------------------------ deterministic parameter initialization --------------------
def init_params(key):
    ks = jax.random.split(key, 11)

    def uni(k, shape, scale):
        return jax.random.uniform(k, shape, jnp.float32, -scale, scale)

    w1 = uni(ks[0], (CIN, F1), 1.0 / (CIN ** 0.5))
    b1 = uni(ks[1], (1, F1), 1.0 / (CIN ** 0.5))
    g1 = jnp.ones((1, F1), jnp.float32)     # GroupNorm weight (default ones)
    be1 = jnp.zeros((1, F1), jnp.float32)   # GroupNorm bias (default zeros)

    w2 = uni(ks[2], (F1, F2), 1.0 / (F1 ** 0.5))
    b2 = uni(ks[3], (1, F2), 1.0 / (F1 ** 0.5))
    g2 = jnp.ones((1, F2), jnp.float32)
    be2 = jnp.zeros((1, F2), jnp.float32)

    wp = uni(ks[4], (F2, Z_PRES), 1.0 / (F2 ** 0.5))
    bp = uni(ks[5], (1, Z_PRES), 1.0 / (F2 ** 0.5))

    # q_where_net: weight ~ U(-0.01, 0.01); bias[0] = -1.0, bias[1:] = 0
    ww = uni(ks[6], (F2, 2 * Z_WHERE), 0.01)
    bw = jnp.zeros((1, 2 * Z_WHERE), jnp.float32).at[0, 0].set(-1.0)

    wd = uni(ks[7], (F2, 2 * Z_DEPTH), 1.0 / (F2 ** 0.5))
    bd = uni(ks[8], (1, 2 * Z_DEPTH), 1.0 / (F2 ** 0.5))

    wq = uni(ks[9], (F2, 2 * Z_WHAT), 1.0 / (F2 ** 0.5))
    bq = uni(ks[10], (1, 2 * Z_WHAT), 1.0 / (F2 ** 0.5))

    return (w1, b1, g1, be1, w2, b2, g2, be2, wp, bp, ww, bw, wd, bd, wq, bq)


# -------------------- pure-JAX reference (module semantics, NCHW) -------------------
def reference_forward(img_enc_nchw, params):
    (w1, b1, g1, be1, w2, b2, g2, be2, wp, bp, ww, bw, wd, bd, wq, bq) = params
    HP = lax.Precision.HIGHEST
    x = jnp.transpose(img_enc_nchw, (0, 2, 3, 1))             # [B, H, W, C]

    def celu(v):
        return jnp.where(v > 0.0, v, jnp.exp(jnp.minimum(v, 0.0)) - 1.0)

    def softplus(v):
        return jnp.maximum(v, 0.0) + jnp.log1p(jnp.exp(-jnp.abs(v)))

    def group_norm(h, gamma, beta):
        Bb, Hh, Ww, F = h.shape
        hg = h.reshape(Bb, Hh * Ww, N_GROUPS, F // N_GROUPS)
        mean = jnp.mean(hg, axis=(1, 3), keepdims=True)
        var = jnp.mean((hg - mean) ** 2, axis=(1, 3), keepdims=True)
        hn = ((hg - mean) / jnp.sqrt(var + GN_EPS)).reshape(Bb, Hh, Ww, F)
        return hn * gamma.reshape(1, 1, 1, F) + beta.reshape(1, 1, 1, F)

    h = jnp.dot(x, w1, precision=HP) + b1.reshape(1, 1, 1, -1)
    h = group_norm(celu(h), g1, be1)
    h = jnp.dot(h, w2, precision=HP) + b2.reshape(1, 1, 1, -1)
    h = group_norm(celu(h), g2, be2)

    pres = jnp.tanh(jnp.dot(h, wp, precision=HP) + bp.reshape(1, 1, 1, -1)) * PRES_LOGIT_SCALE
    wout = jnp.dot(h, ww, precision=HP) + bw.reshape(1, 1, 1, -1)
    dout = jnp.dot(h, wd, precision=HP) + bd.reshape(1, 1, 1, -1)
    qout = jnp.dot(h, wq, precision=HP) + bq.reshape(1, 1, 1, -1)
    wmean, wstd = jnp.split(wout, 2, axis=-1)
    dmean, dstd = jnp.split(dout, 2, axis=-1)
    qmean, qstd = jnp.split(qout, 2, axis=-1)
    outs = [pres, wmean, softplus(wstd), dmean, softplus(dstd), qmean, softplus(qstd)]
    return [jnp.transpose(o, (0, 3, 1, 2)) for o in outs]


if __name__ == "__main__":
    key = jax.random.PRNGKey(0)
    k_inp, k_par = jax.random.split(key)
    img_enc = jax.random.normal(k_inp, (B, IMG_ENC_DIM, H, W), jnp.float32)
    params = init_params(k_par)
    packed = pack_params(params)       # one-time parameter packing, off the hot path

    ss = local_latent_decoder(img_enc, packed)
    ss = jax.block_until_ready(ss)

    # shape / range sanity
    expected = [(B, Z_PRES, H, W), (B, Z_WHERE, H, W), (B, Z_WHERE, H, W),
                (B, Z_DEPTH, H, W), (B, Z_DEPTH, H, W), (B, Z_WHAT, H, W),
                (B, Z_WHAT, H, W)]
    assert [tuple(o.shape) for o in ss] == expected, [tuple(o.shape) for o in ss]
    assert all(bool(jnp.all(jnp.isfinite(o))) for o in ss)
    assert bool(jnp.all(ss[2] > 0)) and bool(jnp.all(ss[4] > 0)) and bool(jnp.all(ss[6] > 0))
    assert bool(jnp.all(jnp.abs(ss[0]) <= PRES_LOGIT_SCALE + 1e-5))

    # numerical check against a pure-JAX reference of the PyTorch module
    ref = reference_forward(img_enc, params)
    for o, r in zip(ss, ref):
        np.testing.assert_allclose(np.asarray(o), np.asarray(r), rtol=2e-2, atol=6e-2)

    print("KERNEL_OK")
</pallas_src>

<mosaic_0001>
module attributes {stable_mosaic.version = 11 : i64} {
  func.func @local_latent_decoder_kernel(%arg0: memref<32x32xf32, #tpu.memory_space<vmem>>, %arg1: memref<160x128xf32, #tpu.memory_space<vmem>>, %arg2: memref<80x128xf32, #tpu.memory_space<vmem>>, %arg3: memref<32x128xf32, #tpu.memory_space<vmem>>) attributes {dimension_semantics = [], scalar_prefetch = 0 : i64, scratch_operands = 0 : i64, tpu.core_type = #tpu.core_type<tc>} {
    %c0 = arith.constant 0 : index
    %c0_0 = arith.constant 0 : index
    %0 = vector.load %arg0[%c0, %c0_0] : memref<32x32xf32, #tpu.memory_space<vmem>>, vector<32x32xf32>
    %c0_1 = arith.constant 0 : index
    %c0_2 = arith.constant 0 : index
    %1 = vector.load %arg1[%c0_1, %c0_2] : memref<160x128xf32, #tpu.memory_space<vmem>>, vector<32x64xf32>
    %c32 = arith.constant 32 : index
    %c0_3 = arith.constant 0 : index
    %2 = vector.load %arg1[%c32, %c0_3] : memref<160x128xf32, #tpu.memory_space<vmem>>, vector<64x64xf32>
    %c96 = arith.constant 96 : index
    %c0_4 = arith.constant 0 : index
    %3 = vector.load %arg1[%c96, %c0_4] : memref<160x128xf32, #tpu.memory_space<vmem>>, vector<64x128xf32>
    %c0_5 = arith.constant 0 : index
    %c0_6 = arith.constant 0 : index
    %4 = vector.load %arg2[%c0_5, %c0_6] : memref<80x128xf32, #tpu.memory_space<vmem>>, vector<1x64xf32>
    %c1 = arith.constant 1 : index
    %c0_7 = arith.constant 0 : index
    %5 = vector.load %arg2[%c1, %c0_7] : memref<80x128xf32, #tpu.memory_space<vmem>>, vector<1x64xf32>
    %c2 = arith.constant 2 : index
    %c0_8 = arith.constant 0 : index
    %6 = vector.load %arg2[%c2, %c0_8] : memref<80x128xf32, #tpu.memory_space<vmem>>, vector<1x128xf32>
    %c3 = arith.constant 3 : index
    %c0_9 = arith.constant 0 : index
    %7 = vector.load %arg2[%c3, %c0_9] : memref<80x128xf32, #tpu.memory_space<vmem>>, vector<1x128xf32>
    %c4 = arith.constant 4 : index
    %c0_10 = arith.constant 0 : index
    %8 = vector.load %arg2[%c4, %c0_10] : memref<80x128xf32, #tpu.memory_space<vmem>>, vector<1x128xf32>
    %c8 = arith.constant 8 : index
    %c0_11 = arith.constant 0 : index
    %9 = vector.load %arg2[%c8, %c0_11] : memref<80x128xf32, #tpu.memory_space<vmem>>, vector<8x64xf32>
    %c16 = arith.constant 16 : index
    %c0_12 = arith.constant 0 : index
    %10 = vector.load %arg2[%c16, %c0_12] : memref<80x128xf32, #tpu.memory_space<vmem>>, vector<64x8xf32>
    %cst = arith.constant dense<0.000000e+00> : vector<32x64xf32>
    %11 = tpu.matmul %0, %1, %cst {dimension_numbers = #tpu.dot_dimension_numbers<[1], [0], [0], [1], [0, 0, 1, 1], [], []>} : vector<32x32xf32>, vector<32x64xf32>, vector<32x64xf32> -> vector<32x64xf32>
    %12 = vector.broadcast %4 : vector<1x64xf32> to vector<32x64xf32>
    %13 = arith.addf %11, %12 : vector<32x64xf32>
    %cst_13 = arith.constant 0.000000e+00 : f32
    %14 = vector.broadcast %cst_13 : f32 to vector<32x64xf32>
    %15 = arith.cmpf ogt, %13, %14 : vector<32x64xf32>
    %cst_14 = arith.constant 0.000000e+00 : f32
    %16 = vector.broadcast %cst_14 : f32 to vector<32x64xf32>
    %17 = arith.minimumf %13, %16 : vector<32x64xf32>
    %18 = math.exp %17 : vector<32x64xf32>
    %cst_15 = arith.constant 1.000000e+00 : f32
    %19 = vector.broadcast %cst_15 : f32 to vector<32x64xf32>
    %20 = arith.subf %18, %19 : vector<32x64xf32>
    %21 = arith.select %15, %13, %20 : vector<32x64xi1>, vector<32x64xf32>
    %22 = vector.extract_strided_slice %21 {offsets = [0, 0], sizes = [16, 64], strides = [1, 1]} : vector<32x64xf32> to vector<16x64xf32>
    %cst_16 = arith.constant dense<0.000000e+00> : vector<64xf32>
    %23 = vector.multi_reduction <add>, %22, %cst_16 [0] : vector<16x64xf32> to vector<64xf32>
    %24 = vector.shape_cast %23 : vector<64xf32> to vector<1x64xf32>
    %25 = arith.mulf %22, %22 : vector<16x64xf32>
    %cst_17 = arith.constant dense<0.000000e+00> : vector<64xf32>
    %26 = vector.multi_reduction <add>, %25, %cst_17 [0] : vector<16x64xf32> to vector<64xf32>
    %27 = vector.shape_cast %26 : vector<64xf32> to vector<1x64xf32>
    %28 = tpu.concatenate %24, %27 in 0 : vector<1x64xf32>, vector<1x64xf32> -> vector<2x64xf32>
    %cst_18 = arith.constant dense<0.000000e+00> : vector<2x8xf32>
    %29 = tpu.matmul %28, %10, %cst_18 {dimension_numbers = #tpu.dot_dimension_numbers<[1], [0], [0], [1], [0, 0, 1, 1], [], []>} : vector<2x64xf32>, vector<64x8xf32>, vector<2x8xf32> -> vector<2x8xf32>
    %cst_19 = arith.constant 7.812500e-03 : f32
    %30 = vector.broadcast %cst_19 : f32 to vector<2x8xf32>
    %31 = arith.mulf %29, %30 : vector<2x8xf32>
    %32 = vector.extract_strided_slice %31 {offsets = [0, 0], sizes = [1, 8], strides = [1, 1]} : vector<2x8xf32> to vector<1x8xf32>
    %33 = vector.extract_strided_slice %31 {offsets = [1, 0], sizes = [1, 8], strides = [1, 1]} : vector<2x8xf32> to vector<1x8xf32>
    %34 = arith.mulf %32, %32 : vector<1x8xf32>
    %35 = arith.subf %33, %34 : vector<1x8xf32>
    %cst_20 = arith.constant 0.000000e+00 : f32
    %36 = vector.broadcast %cst_20 : f32 to vector<1x8xf32>
    %37 = arith.maximumf %35, %36 : vector<1x8xf32>
    %cst_21 = arith.constant 9.99999974E-6 : f32
    %38 = vector.broadcast %cst_21 : f32 to vector<1x8xf32>
    %39 = arith.addf %37, %38 : vector<1x8xf32>
    %40 = math.rsqrt %39 : vector<1x8xf32>
    %41 = tpu.concatenate %32, %40 in 0 : vector<1x8xf32>, vector<1x8xf32> -> vector<2x8xf32>
    %cst_22 = arith.constant dense<0.000000e+00> : vector<2x64xf32>
    %42 = tpu.matmul %41, %9, %cst_22 {dimension_numbers = #tpu.dot_dimension_numbers<[1], [0], [0], [1], [0, 0, 1, 1], [], []>} : vector<2x8xf32>, vector<8x64xf32>, vector<2x64xf32> -> vector<2x64xf32>
    %43 = vector.extract_strided_slice %42 {offsets = [0, 0], sizes = [1, 64], strides = [1, 1]} : vector<2x64xf32> to vector<1x64xf32>
    %44 = vector.broadcast %43 : vector<1x64xf32> to vector<16x64xf32>
    %45 = arith.subf %22, %44 : vector<16x64xf32>
    %46 = vector.extract_strided_slice %42 {offsets = [1, 0], sizes = [1, 64], strides = [1, 1]} : vector<2x64xf32> to vector<1x64xf32>
    %47 = vector.broadcast %46 : vector<1x64xf32> to vector<16x64xf32>
    %48 = arith.mulf %45, %47 : vector<16x64xf32>
    %49 = vector.extract_strided_slice %21 {offsets = [16, 0], sizes = [16, 64], strides = [1, 1]} : vector<32x64xf32> to vector<16x64xf32>
    %cst_23 = arith.constant dense<0.000000e+00> : vector<64xf32>
    %50 = vector.multi_reduction <add>, %49, %cst_23 [0] : vector<16x64xf32> to vector<64xf32>
    %51 = vector.shape_cast %50 : vector<64xf32> to vector<1x64xf32>
    %52 = arith.mulf %49, %49 : vector<16x64xf32>
    %cst_24 = arith.constant dense<0.000000e+00> : vector<64xf32>
    %53 = vector.multi_reduction <add>, %52, %cst_24 [0] : vector<16x64xf32> to vector<64xf32>
    %54 = vector.shape_cast %53 : vector<64xf32> to vector<1x64xf32>
    %55 = tpu.concatenate %51, %54 in 0 : vector<1x64xf32>, vector<1x64xf32> -> vector<2x64xf32>
    %cst_25 = arith.constant dense<0.000000e+00> : vector<2x8xf32>
    %56 = tpu.matmul %55, %10, %cst_25 {dimension_numbers = #tpu.dot_dimension_numbers<[1], [0], [0], [1], [0, 0, 1, 1], [], []>} : vector<2x64xf32>, vector<64x8xf32>, vector<2x8xf32> -> vector<2x8xf32>
    %cst_26 = arith.constant 7.812500e-03 : f32
    %57 = vector.broadcast %cst_26 : f32 to vector<2x8xf32>
    %58 = arith.mulf %56, %57 : vector<2x8xf32>
    %59 = vector.extract_strided_slice %58 {offsets = [0, 0], sizes = [1, 8], strides = [1, 1]} : vector<2x8xf32> to vector<1x8xf32>
    %60 = vector.extract_strided_slice %58 {offsets = [1, 0], sizes = [1, 8], strides = [1, 1]} : vector<2x8xf32> to vector<1x8xf32>
    %61 = arith.mulf %59, %59 : vector<1x8xf32>
    %62 = arith.subf %60, %61 : vector<1x8xf32>
    %cst_27 = arith.constant 0.000000e+00 : f32
    %63 = vector.broadcast %cst_27 : f32 to vector<1x8xf32>
    %64 = arith.maximumf %62, %63 : vector<1x8xf32>
    %cst_28 = arith.constant 9.99999974E-6 : f32
    %65 = vector.broadcast %cst_28 : f32 to vector<1x8xf32>
    %66 = arith.addf %64, %65 : vector<1x8xf32>
    %67 = math.rsqrt %66 : vector<1x8xf32>
    %68 = tpu.concatenate %59, %67 in 0 : vector<1x8xf32>, vector<1x8xf32> -> vector<2x8xf32>
    %cst_29 = arith.constant dense<0.000000e+00> : vector<2x64xf32>
    %69 = tpu.matmul %68, %9, %cst_29 {dimension_numbers = #tpu.dot_dimension_numbers<[1], [0], [0], [1], [0, 0, 1, 1], [], []>} : vector<2x8xf32>, vector<8x64xf32>, vector<2x64xf32> -> vector<2x64xf32>
    %70 = vector.extract_strided_slice %69 {offsets = [0, 0], sizes = [1, 64], strides = [1, 1]} : vector<2x64xf32> to vector<1x64xf32>
    %71 = vector.broadcast %70 : vector<1x64xf32> to vector<16x64xf32>
    %72 = arith.subf %49, %71 : vector<16x64xf32>
    %73 = vector.extract_strided_slice %69 {offsets = [1, 0], sizes = [1, 64], strides = [1, 1]} : vector<2x64xf32> to vector<1x64xf32>
    %74 = vector.broadcast %73 : vector<1x64xf32> to vector<16x64xf32>
    %75 = arith.mulf %72, %74 : vector<16x64xf32>
    %76 = tpu.concatenate %48, %75 in 0 : vector<16x64xf32>, vector<16x64xf32> -> vector<32x64xf32>
    %cst_30 = arith.constant dense<0.000000e+00> : vector<32x64xf32>
    %77 = tpu.matmul %76, %2, %cst_30 {dimension_numbers = #tpu.dot_dimension_numbers<[1], [0], [0], [1], [0, 0, 1, 1], [], []>} : vector<32x64xf32>, vector<64x64xf32>, vector<32x64xf32> -> vector<32x64xf32>
    %78 = vector.broadcast %5 : vector<1x64xf32> to vector<32x64xf32>
    %79 = arith.addf %77, %78 : vector<32x64xf32>
    %cst_31 = arith.constant 0.000000e+00 : f32
    %80 = vector.broadcast %cst_31 : f32 to vector<32x64xf32>
    %81 = arith.cmpf ogt, %79, %80 : vector<32x64xf32>
    %cst_32 = arith.constant 0.000000e+00 : f32
    %82 = vector.broadcast %cst_32 : f32 to vector<32x64xf32>
    %83 = arith.minimumf %79, %82 : vector<32x64xf32>
    %84 = math.exp %83 : vector<32x64xf32>
    %cst_33 = arith.constant 1.000000e+00 : f32
    %85 = vector.broadcast %cst_33 : f32 to vector<32x64xf32>
    %86 = arith.subf %84, %85 : vector<32x64xf32>
    %87 = arith.select %81, %79, %86 : vector<32x64xi1>, vector<32x64xf32>
    %88 = vector.extract_strided_slice %87 {offsets = [0, 0], sizes = [16, 64], strides = [1, 1]} : vector<32x64xf32> to vector<16x64xf32>
    %cst_34 = arith.constant dense<0.000000e+00> : vector<64xf32>
    %89 = vector.multi_reduction <add>, %88, %cst_34 [0] : vector<16x64xf32> to vector<64xf32>
    %90 = vector.shape_cast %89 : vector<64xf32> to vector<1x64xf32>
    %91 = arith.mulf %88, %88 : vector<16x64xf32>
    %cst_35 = arith.constant dense<0.000000e+00> : vector<64xf32>
    %92 = vector.multi_reduction <add>, %91, %cst_35 [0] : vector<16x64xf32> to vector<64xf32>
    %93 = vector.shape_cast %92 : vector<64xf32> to vector<1x64xf32>
    %94 = tpu.concatenate %90, %93 in 0 : vector<1x64xf32>, vector<1x64xf32> -> vector<2x64xf32>
    %cst_36 = arith.constant dense<0.000000e+00> : vector<2x8xf32>
    %95 = tpu.matmul %94, %10, %cst_36 {dimension_numbers = #tpu.dot_dimension_numbers<[1], [0], [0], [1], [0, 0, 1, 1], [], []>} : vector<2x64xf32>, vector<64x8xf32>, vector<2x8xf32> -> vector<2x8xf32>
    %cst_37 = arith.constant 7.812500e-03 : f32
    %96 = vector.broadcast %cst_37 : f32 to vector<2x8xf32>
    %97 = arith.mulf %95, %96 : vector<2x8xf32>
    %98 = vector.extract_strided_slice %97 {offsets = [0, 0], sizes = [1, 8], strides = [1, 1]} : vector<2x8xf32> to vector<1x8xf32>
    %99 = vector.extract_strided_slice %97 {offsets = [1, 0], sizes = [1, 8], strides = [1, 1]} : vector<2x8xf32> to vector<1x8xf32>
    %100 = arith.mulf %98, %98 : vector<1x8xf32>
    %101 = arith.subf %99, %100 : vector<1x8xf32>
    %cst_38 = arith.constant 0.000000e+00 : f32
    %102 = vector.broadcast %cst_38 : f32 to vector<1x8xf32>
    %103 = arith.maximumf %101, %102 : vector<1x8xf32>
    %cst_39 = arith.constant 9.99999974E-6 : f32
    %104 = vector.broadcast %cst_39 : f32 to vector<1x8xf32>
    %105 = arith.addf %103, %104 : vector<1x8xf32>
    %106 = math.rsqrt %105 : vector<1x8xf32>
    %107 = tpu.concatenate %98, %106 in 0 : vector<1x8xf32>, vector<1x8xf32> -> vector<2x8xf32>
    %cst_40 = arith.constant dense<0.000000e+00> : vector<2x64xf32>
    %108 = tpu.matmul %107, %9, %cst_40 {dimension_numbers = #tpu.dot_dimension_numbers<[1], [0], [0], [1], [0, 0, 1, 1], [], []>} : vector<2x8xf32>, vector<8x64xf32>, vector<2x64xf32> -> vector<2x64xf32>
    %109 = vector.extract_strided_slice %108 {offsets = [0, 0], sizes = [1, 64], strides = [1, 1]} : vector<2x64xf32> to vector<1x64xf32>
    %110 = vector.broadcast %109 : vector<1x64xf32> to vector<16x64xf32>
    %111 = arith.subf %88, %110 : vector<16x64xf32>
    %112 = vector.extract_strided_slice %108 {offsets = [1, 0], sizes = [1, 64], strides = [1, 1]} : vector<2x64xf32> to vector<1x64xf32>
    %113 = vector.broadcast %112 : vector<1x64xf32> to vector<16x64xf32>
    %114 = arith.mulf %111, %113 : vector<16x64xf32>
    %115 = vector.extract_strided_slice %87 {offsets = [16, 0], sizes = [16, 64], strides = [1, 1]} : vector<32x64xf32> to vector<16x64xf32>
    %cst_41 = arith.constant dense<0.000000e+00> : vector<64xf32>
    %116 = vector.multi_reduction <add>, %115, %cst_41 [0] : vector<16x64xf32> to vector<64xf32>
    %117 = vector.shape_cast %116 : vector<64xf32> to vector<1x64xf32>
    %118 = arith.mulf %115, %115 : vector<16x64xf32>
    %cst_42 = arith.constant dense<0.000000e+00> : vector<64xf32>
    %119 = vector.multi_reduction <add>, %118, %cst_42 [0] : vector<16x64xf32> to vector<64xf32>
    %120 = vector.shape_cast %119 : vector<64xf32> to vector<1x64xf32>
    %121 = tpu.concatenate %117, %120 in 0 : vector<1x64xf32>, vector<1x64xf32> -> vector<2x64xf32>
    %cst_43 = arith.constant dense<0.000000e+00> : vector<2x8xf32>
    %122 = tpu.matmul %121, %10, %cst_43 {dimension_numbers = #tpu.dot_dimension_numbers<[1], [0], [0], [1], [0, 0, 1, 1], [], []>} : vector<2x64xf32>, vector<64x8xf32>, vector<2x8xf32> -> vector<2x8xf32>
    %cst_44 = arith.constant 7.812500e-03 : f32
    %123 = vector.broadcast %cst_44 : f32 to vector<2x8xf32>
    %124 = arith.mulf %122, %123 : vector<2x8xf32>
    %125 = vector.extract_strided_slice %124 {offsets = [0, 0], sizes = [1, 8], strides = [1, 1]} : vector<2x8xf32> to vector<1x8xf32>
    %126 = vector.extract_strided_slice %124 {offsets = [1, 0], sizes = [1, 8], strides = [1, 1]} : vector<2x8xf32> to vector<1x8xf32>
    %127 = arith.mulf %125, %125 : vector<1x8xf32>
    %128 = arith.subf %126, %127 : vector<1x8xf32>
    %cst_45 = arith.constant 0.000000e+00 : f32
    %129 = vector.broadcast %cst_45 : f32 to vector<1x8xf32>
    %130 = arith.maximumf %128, %129 : vector<1x8xf32>
    %cst_46 = arith.constant 9.99999974E-6 : f32
    %131 = vector.broadcast %cst_46 : f32 to vector<1x8xf32>
    %132 = arith.addf %130, %131 : vector<1x8xf32>
    %133 = math.rsqrt %132 : vector<1x8xf32>
    %134 = tpu.concatenate %125, %133 in 0 : vector<1x8xf32>, vector<1x8xf32> -> vector<2x8xf32>
    %cst_47 = arith.constant dense<0.000000e+00> : vector<2x64xf32>
    %135 = tpu.matmul %134, %9, %cst_47 {dimension_numbers = #tpu.dot_dimension_numbers<[1], [0], [0], [1], [0, 0, 1, 1], [], []>} : vector<2x8xf32>, vector<8x64xf32>, vector<2x64xf32> -> vector<2x64xf32>
    %136 = vector.extract_strided_slice %135 {offsets = [0, 0], sizes = [1, 64], strides = [1, 1]} : vector<2x64xf32> to vector<1x64xf32>
    %137 = vector.broadcast %136 : vector<1x64xf32> to vector<16x64xf32>
    %138 = arith.subf %115, %137 : vector<16x64xf32>
    %139 = vector.extract_strided_slice %135 {offsets = [1, 0], sizes = [1, 64], strides = [1, 1]} : vector<2x64xf32> to vector<1x64xf32>
    %140 = vector.broadcast %139 : vector<1x64xf32> to vector<16x64xf32>
    %141 = arith.mulf %138, %140 : vector<16x64xf32>
    %142 = tpu.concatenate %114, %141 in 0 : vector<16x64xf32>, vector<16x64xf32> -> vector<32x64xf32>
    %cst_48 = arith.constant dense<0.000000e+00> : vector<32x128xf32>
    %143 = tpu.matmul %142, %3, %cst_48 {dimension_numbers = #tpu.dot_dimension_numbers<[1], [0], [0], [1], [0, 0, 1, 1], [], []>} : vector<32x64xf32>, vector<64x128xf32>, vector<32x128xf32> -> vector<32x128xf32>
    %144 = vector.broadcast %6 : vector<1x128xf32> to vector<32x128xf32>
    %145 = arith.addf %143, %144 : vector<32x128xf32>
    %cst_49 = arith.constant 5.000000e-01 : f32
    %146 = vector.broadcast %cst_49 : f32 to vector<1x128xf32>
    %147 = arith.cmpf ogt, %7, %146 : vector<1x128xf32>
    %148 = math.tanh %145 : vector<32x128xf32>
    %cst_50 = arith.constant 8.800000e+00 : f32
    %149 = vector.broadcast %cst_50 : f32 to vector<32x128xf32>
    %150 = arith.mulf %148, %149 : vector<32x128xf32>
    %cst_51 = arith.constant 5.000000e-01 : f32
    %151 = vector.broadcast %cst_51 : f32 to vector<1x128xf32>
    %152 = arith.cmpf ogt, %8, %151 : vector<1x128xf32>
    %cst_52 = arith.constant 0.000000e+00 : f32
    %153 = vector.broadcast %cst_52 : f32 to vector<32x128xf32>
    %154 = arith.maximumf %145, %153 : vector<32x128xf32>
    %155 = math.absf %145 : vector<32x128xf32>
    %cst_53 = arith.constant 0.000000e+00 : f32
    %156 = vector.broadcast %cst_53 : f32 to vector<32x128xf32>
    %157 = arith.subf %156, %155 : vector<32x128xf32>
    %158 = math.exp %157 : vector<32x128xf32>
    %cst_54 = arith.constant 1.000000e+00 : f32
    %159 = vector.broadcast %cst_54 : f32 to vector<32x128xf32>
    %160 = arith.addf %159, %158 : vector<32x128xf32>
    %161 = math.log %160 : vector<32x128xf32>
    %162 = arith.addf %154, %161 : vector<32x128xf32>
    %163 = vector.shape_cast %152 : vector<1x128xi1> to vector<1x128xi1>
    %164 = vector.broadcast %163 : vector<1x128xi1> to vector<32x128xi1>
    %165 = arith.select %164, %162, %145 : vector<32x128xi1>, vector<32x128xf32>
    %166 = vector.shape_cast %147 : vector<1x128xi1> to vector<1x128xi1>
    %167 = vector.broadcast %166 : vector<1x128xi1> to vector<32x128xi1>
    %168 = arith.select %167, %150, %165 : vector<32x128xi1>, vector<32x128xf32>
    %c0_55 = arith.constant 0 : index
    %c0_56 = arith.constant 0 : index
    %169 = vector.load %arg3[%c0_55, %c0_56] : memref<32x128xf32, #tpu.memory_space<vmem>>, vector<32x128xf32>
    tpu.vector_store %arg3[%c0_55, %c0_56], %168 {strides = array<i32>} : memref<32x128xf32, #tpu.memory_space<vmem>>, vector<32x128xf32>,
    return
  }
}

</mosaic_0001>

<bundles_post_ra>
// kernel: tpu_custom_call.1
= control target key start
LH: loop header
LB: loop body
LE: loop exit
PB: predicated region body
PF: predicated region fallthrough
CT: control target
= control target key end

     0   :  { %8 = vsyncpa [#allocation3], 0  ;;  %s1087_s0 = inlined_call_operand.hbm [shape: f32[32,32], index: 0, kind: input, shape index: {}]   ;;  %s1088_s1 = inlined_call_operand.hbm [shape: f32[160,128], index: 1, kind: input, shape index: {}]   ;;  %s1089_s2 = inlined_call_operand.hbm [shape: f32[80,128], index: 2, kind: input, shape index: {}]   ;;  %s1090_s3 = inlined_call_operand.hbm [shape: f32[32,128], index: 3, kind: output, shape index: {}]  }
   0x1   :  { %9 = vsyncpa [#allocation6], 0 }
   0x2   :  { %10 = vsyncpa [#allocation4], 0  ;;  %s28_s14 = sshll.u32 %s1088_s1, 4  ;;  %s918_s15 = smov [#allocation5]   ;;  %s29_s14 = int_to_ptr.hbm [resolvable:$true] %s28_s14 }
   0x3   :  { %s30_s16 = sshll.u32 %s918_s15, 4  ;;  %s15_s19 = sshll.u32 %s1087_s0, 4  ;;  %s31_s16 = int_to_ptr.vmem [resolvable:$true] %s30_s16  ;;  %s16_s19 = int_to_ptr.hbm [resolvable:$true] %s15_s19 }
   0x4   :  { %s919_s20 = smov 128   ;;  %s920_s21 = smov 8  }
   0x5   :  { %36 = dma.hbm_to_vmem [thread:$0]  %s29_s14, 2560, %s31_s16, [#allocation6], %s919_s20, %s919_s20, %s920_s21  }
   0x6   :  { %s921_s22 = smov [#allocation2]   ;;  %s41_s1 = sshll.u32 %s1089_s2, 4  ;;  %s42_s1 = int_to_ptr.hbm [resolvable:$true] %s41_s1 }
   0x7   :  { %s17_s23 = sshll.u32 %s921_s22, 4  ;;  %s922_s0 = smov [#allocation7]   ;;  %s18_s23 = int_to_ptr.vmem [resolvable:$true] %s17_s23 }
   0x8   :  { %23 = dma.hbm_to_vmem [thread:$0]  %s16_s19, 512, %s18_s23, [#allocation3], %s919_s20, %s919_s20, %s920_s21  }
   0x9   :  { %s43_s26 = sshll.u32 %s922_s0, 4  ;;  %s44_s26 = int_to_ptr.vmem [resolvable:$true] %s43_s26 }
   0xa   :  { %49 = dma.hbm_to_vmem [thread:$0]  %s42_s1, 1280, %s44_s26, [#allocation6], %s919_s20, %s919_s20, %s920_s21  }
   0xb   :  { %912 = dma.done.wait [#allocation3], 512  }
   0xc   :  { %913 = vsyncadd [#allocation3], 4294966784 }
   0xd   :  { %914 = dma.done.wait [#allocation6], 3840  }
   0xe   :  { %915 = vsyncadd [#allocation6], 4294963456  ;;  %v69_v0 = vld [vmem:[#allocation5 + $0x18] sm:$0xff]  ;;  %v68_v1 = vld [vmem:[#allocation5 + $0x10] sm:$0xff]  ;;  %vm101_vm0 = vcmask 261120   ;;  %vm167_vm2 = vcmask 523264  }
   0xf   :  { %126 = vmatpush.msra.mxu0 %v69_v0  ;;  %v67_v2 = vld [vmem:[#allocation5 + $0x8] sm:$0xff]  ;;  %v66_v3 = vld [vmem:[#allocation5] sm:$0xff]  ;;  %v64_v6 = vld [vmem:[#allocation2 + $0x10] sm:$0xff]  ;;  %vm188_vm6 = vcmask 1040384   ;;  %vm232_vm10 = vcmask 64512   ;;  %s924_s2 = smov [#allocation8]  }
  0x10   :  { %v62_v4 = vld [vmem:[#allocation2] sm:$0xff]  ;;  %v63_v5 = vld [vmem:[#allocation2 + $0x8] sm:$0xff]  ;;  %v65_v7 = vld [vmem:[#allocation2 + $0x18] sm:$0xff]  ;;  %s714_s27 = sshll.u32 %s924_s2, 4  ;;  %s716_s30 = sshll.u32 %s1090_s3, 4  ;;  %s715_s27 = int_to_ptr.vmem [resolvable:$true] %s714_s27  ;;  %s717_s30 = int_to_ptr.hbm [resolvable:$true] %s716_s30 }
  0x11   :  { %127 = vmatpush.msra.mxu0 %v68_v1  ;;  %v99_v8 = vld [vmem:[#allocation7 + $0x48] sm:$0xff]  ;;  %v963_v9 = vld [vmem:[#allocation7] ss:$0 sm:$0xff]  ;;  %v97_v11 = vld [vmem:[#allocation7 + $0x38] sm:$0xff] }
  0x12   :  { %201 = vmatpush.msra.mxu3 %v99_v8  ;;  %v98_v10 = vld [vmem:[#allocation7 + $0x40] sm:$0xff]  ;;  %452 = vmatpush.msra.mxu1 %v99_v8  ;;  %v96_v14 = vld [vmem:[#allocation7 + $0x30] sm:$0xff]  ;;  %v95_v16 = vld [vmem:[#allocation7 + $0x28] sm:$0xff] }
  0x13   :  { %128 = vmatpush.msra.mxu0 %v67_v2  ;;  %v94_v18 = vld [vmem:[#allocation7 + $0x20] sm:$0xff]  ;;  %v93_v19 = vld [vmem:[#allocation7 + $0x18] sm:$0xff]  ;;  %v92_v22 = vld [vmem:[#allocation7 + $0x10] sm:$0xff] }
  0x14   :  { %202 = vmatpush.msra.mxu3 %v98_v10  ;;  %453 = vmatpush.msra.mxu1 %v98_v10 }
  0x15   :  { %129 = vmatpush.msra.mxu0 %v66_v3 }
  0x16   :  { %730 = vmatmul.msk.f32.vlgmr.msra.gmra.mxu0 %vm101_vm0, %v62_v4  ;;  %203 = vmatpush.msra.mxu3 %v97_v11 }
  0x17   :  { %544 = vmatpush.msrb.mxu0 %v99_v8  ;;  %454 = vmatpush.msra.mxu1 %v97_v11 }
  0x18   :  { %204 = vmatpush.msra.mxu3 %v96_v14 }
  0x19   :  { %545 = vmatpush.msrb.mxu0 %v98_v10  ;;  %455 = vmatpush.msra.mxu1 %v96_v14 }
  0x1a   :  { %205 = vmatpush.msra.mxu3 %v95_v16 }
  0x1b   :  { %546 = vmatpush.msrb.mxu0 %v97_v11  ;;  %456 = vmatpush.msra.mxu1 %v95_v16 }
  0x1c   :  { %206 = vmatpush.msra.mxu3 %v94_v18 }
  0x1d   :  { %547 = vmatpush.msrb.mxu0 %v96_v14  ;;  %457 = vmatpush.msra.mxu1 %v94_v18 }
  0x1e   :  { %731 = vmatmul.msk.f32.gmra.mxu0 %vm101_vm0, %v63_v5  ;;  %207 = vmatpush.msra.mxu3 %v93_v19 }
  0x1f   :  { %548 = vmatpush.msrb.mxu0 %v95_v16  ;;  %458 = vmatpush.msra.mxu1 %v93_v19 }
  0x20   :  { %208 = vmatpush.msra.mxu3 %v92_v22 }
  0x21   :  { %549 = vmatpush.msrb.mxu0 %v94_v18  ;;  %459 = vmatpush.msra.mxu1 %v92_v22 }
  0x22   :  { %294 = vmatpush.msrb.mxu3 %v99_v8 }
  0x23   :  { %550 = vmatpush.msrb.mxu0 %v93_v19 }
  0x24   :  { %295 = vmatpush.msrb.mxu3 %v98_v10 }
  0x25   :  { %551 = vmatpush.msrb.mxu0 %v92_v22 }
  0x26   :  { %732 = vmatmul.msk.f32.gmra.mxu0 %vm101_vm0, %v64_v6  ;;  %296 = vmatpush.msrb.mxu3 %v97_v11 }
  0x28   :  { %297 = vmatpush.msrb.mxu3 %v96_v14 }
  0x2a   :  { %298 = vmatpush.msrb.mxu3 %v95_v16 }
  0x2c   :  { %299 = vmatpush.msrb.mxu3 %v94_v18 }
  0x2e   :  { %733 = vmatmul.msk.f32.gmra.mxu0 %vm101_vm0, %v65_v7  ;;  %300 = vmatpush.msrb.mxu3 %v93_v19 }
  0x30   :  { %301 = vmatpush.msrb.mxu3 %v92_v22 }
  0x93   :  { %v131_v12 = vpop.f32.mrf.mxu0 }
  0x94   :  { %v132_v13 = vadd.f32 %v963_v9, %v131_v12 }
  0x96   :  { %v147_v15 = vmin.f32 %v132_v13, 0.0  ;;  %vm143_vm1 = vcmp.gt.f32.partialorder %v132_v13, 0.0 }
  0x98   :  { %v151_v17 = vmul.f32 1.442695, %v147_v15 }
  0x9a   :  { %768 = vpow2.f32 %v151_v17 }
  0x9b   :  { %v134_v20 = vpop.f32.mrf.mxu0 }
  0x9c   :  { %v135_v21 = vadd.f32 %v963_v9, %v134_v20 }
  0x9e   :  { %v148_v23 = vmin.f32 %v135_v21, 0.0  ;;  %vm144_vm3 = vcmp.gt.f32.partialorder %v135_v21, 0.0 }
  0xa0   :  { %v769_v24 = vpop.eup %768  ;;  %v153_v25 = vmul.f32 1.442695, %v148_v23  ;;  %v91_v23 = vld [vmem:[#allocation7 + $0x8] sm:$0xff] }
  0xa1   :  { %v734_v26 = vadd.f32 -1.0, %v769_v24  ;;  %251 = vmatpush.msra.mxu2 %v91_v23 }
  0xa2   :  { %770 = vpow2.f32 %v153_v25 }
  0xa3   :  { %v137_v27 = vpop.f32.mrf.mxu0  ;;  %v968_v30 = vsel %vm143_vm1, %v132_v13, %v734_v26  ;;  %343 = vmatpush.msrb.mxu2 %v91_v23 }
  0xa4   :  { %v138_v28 = vadd.f32 %v963_v9, %v137_v27  ;;  %v177_v34 = vmul.f32 %v968_v30, %v968_v30  ;;  %v168_v37 = vsel %vm167_vm2, %v968_v30, 0.0 }
  0xa6   :  { %v149_v29 = vmin.f32 %v138_v28, 0.0  ;;  %v179_v42 = vsel %vm167_vm2, %v177_v34, 0.0  ;;  %vm145_vm4 = vcmp.gt.f32.partialorder %v138_v28, 0.0 }
  0xa8   :  { %v771_v31 = vpop.eup %770  ;;  %v155_v32 = vmul.f32 1.442695, %v149_v29 }
  0xa9   :  { %v735_v33 = vadd.f32 -1.0, %v771_v31 }
  0xaa   :  { %772 = vpow2.f32 %v155_v32 }
  0xab   :  { %v972_v35 = vsel %vm144_vm3, %v135_v21, %v735_v33  ;;  %v140_v36 = vpop.f32.mrf.mxu0 }
  0xac   :  { %v169_v38 = vsel %vm167_vm2, %v972_v35, 0.0  ;;  %v178_v39 = vmul.f32 %v972_v35, %v972_v35  ;;  %v141_v40 = vadd.f32 %v963_v9, %v140_v36 }
  0xad   :  { %v170_v41 = vadd.f32 %v169_v38, %v168_v37 }
  0xae   :  { %v180_v43 = vsel %vm167_vm2, %v178_v39, 0.0  ;;  %v150_v44 = vmin.f32 %v141_v40, 0.0  ;;  %vm146_vm5 = vcmp.gt.f32.partialorder %v141_v40, 0.0 }
  0xaf   :  { %v171_v45 = vrot.slane %v170_v41, 4  ;;  %v181_v46 = vadd.f32 %v180_v43, %v179_v42 }
  0xb0   :  { %v773_v47 = vpop.eup %772  ;;  %v157_v48 = vmul.f32 1.442695, %v150_v44 }
  0xb1   :  { %v172_v49 = vadd.f32 %v171_v45, %v170_v41  ;;  %v182_v50 = vrot.slane %v181_v46, 4  ;;  %v736_v51 = vadd.f32 -1.0, %v773_v47  ;;  %v77_v47 = vld [vmem:[#allocation5 + $0x58] sm:$0xff] }
  0xb2   :  { %774 = vpow2.f32 %v157_v48 }
  0xb3   :  { %v173_v52 = vrot.slane %v172_v49, 2  ;;  %v183_v53 = vadd.f32 %v182_v50, %v181_v46  ;;  %v983_v56 = vsel %vm145_vm4, %v138_v28, %v736_v51  ;;  %v75_v50 = vld [vmem:[#allocation5 + $0x48] sm:$0xff] }
  0xb4   :  { %v271_v62 = vmul.f32 %v983_v56, %v983_v56  ;;  %v262_v2 = vsel %vm167_vm2, %v983_v56, 0.0 }
  0xb5   :  { %v174_v54 = vadd.f32 %v173_v52, %v172_v49  ;;  %v184_v55 = vrot.slane %v183_v53, 2  ;;  %v76_v49 = vld [vmem:[#allocation5 + $0x50] sm:$0xff] }
  0xb6   :  { %v273_v7 = vsel %vm167_vm2, %v271_v62, 0.0  ;;  %v72_v62 = vld [vmem:[#allocation5 + $0x30] sm:$0xff] }
  0xb7   :  { %v175_v57 = vrot.slane %v174_v54, 1  ;;  %v185_v58 = vadd.f32 %v184_v55, %v183_v53  ;;  %v74_v53 = vld [vmem:[#allocation5 + $0x40] sm:$0xff] }
  0xb8   :  { %v775_v59 = vpop.eup %774 }
  0xb9   :  { %v737_v60 = vadd.f32 -1.0, %v775_v59  ;;  %v186_v61 = vrot.slane %v185_v58, 1  ;;  %v176_v0 = vadd.f32 %v175_v57, %v174_v54 }
  0xbb   :  { %v987_v63 = vsel %vm146_vm5, %v141_v40, %v737_v60  ;;  %v187_v1 = vadd.f32 %v186_v61, %v185_v58  ;;  %v73_v61 = vld [vmem:[#allocation5 + $0x38] sm:$0xff] }
  0xbc   :  { %v263_v3 = vsel %vm167_vm2, %v987_v63, 0.0  ;;  %v272_v4 = vmul.f32 %v987_v63, %v987_v63 }
  0xbd   :  { %v264_v5 = vadd.f32 %v263_v3, %v262_v2  ;;  %v189_v6 = vsel %vm188_vm6, %v176_v0, %v187_v1  ;;  %v71_v0 = vld [vmem:[#allocation5 + $0x28] sm:$0xff]  ;;  %v70_v1 = vld [vmem:[#allocation5 + $0x20] sm:$0xff] }
  0xbe   :  { %v274_v8 = vsel %vm167_vm2, %v272_v4, 0.0  ;;  %738 = vmatmul.msk.f32.vlgmr.msra.gmra.mxu3 %vm167_vm2, %v189_v6 }
  0xbf   :  { %v265_v9 = vrot.slane %v264_v5, 4  ;;  %v275_v10 = vadd.f32 %v274_v8, %v273_v7  ;;  %501 = vmatpush.msra.mxu3 %v91_v23 }
  0xc1   :  { %v266_v11 = vadd.f32 %v265_v9, %v264_v5  ;;  %v276_v12 = vrot.slane %v275_v10, 4 }
  0xc3   :  { %v267_v13 = vrot.slane %v266_v11, 2  ;;  %v277_v14 = vadd.f32 %v276_v12, %v275_v10 }
  0xc5   :  { %v268_v15 = vadd.f32 %v267_v13, %v266_v11  ;;  %v278_v16 = vrot.slane %v277_v14, 2 }
  0xc7   :  { %v269_v17 = vrot.slane %v268_v15, 1  ;;  %v279_v18 = vadd.f32 %v278_v16, %v277_v14 }
  0xc9   :  { %v280_v19 = vrot.slane %v279_v18, 1  ;;  %v270_v20 = vadd.f32 %v269_v17, %v268_v15  ;;  %v766_v15 = vld [vmem:[#allocation7 + $0x1] ss:$0 sm:$0xff] }
  0xcb   :  { %v281_v21 = vadd.f32 %v280_v19, %v279_v18 }
  0xcd   :  { %v282_v22 = vsel %vm188_vm6, %v270_v20, %v281_v21 }
  0xce   :  { %740 = vmatmul.msk.f32.vlgmr.msrb.gmra.mxu3 %vm167_vm2, %v282_v22 }
  0xcf   :  { %593 = vmatpush.msrb.mxu3 %v91_v23 }
 0x141   :  { %v210_v24 = vpop.f32.mrf.mxu3 }
 0x142   :  { %v213_v25 = vmul.f32 0.0078125, %v210_v24 }
 0x144   :  { %v214_v26 = vmul.f32 %v213_v25, %v213_v25 }
 0x146   :  { %v216_v27 = vrot.slane %v214_v26, 7 }
 0x148   :  { %v218_v28 = vsub.f32 %v213_v25, %v216_v27 }
 0x14a   :  { %v219_v29 = vmax.f32 %v218_v28, 0.0 }
 0x14c   :  { %v220_v31 = vadd.f32 1e-05, %v219_v29 }
 0x14e   :  { %776 = vrsqrt.f32 %v220_v31  ;;  %vm227_vm8 = vweird.f32 %v220_v31 }
 0x151   :  { %v303_v32 = vpop.f32.mrf.mxu3 }
 0x152   :  { %v306_v33 = vmul.f32 0.0078125, %v303_v32 }
 0x154   :  { %v777_v34 = vpop.eup %776  ;;  %v307_v36 = vmul.f32 %v306_v33, %v306_v33 }
 0x155   :  { %v222_v37 = vmul.f32 %v777_v34, %v220_v31  ;;  %vm228_vm7 = vweird.f32 %v777_v34 }
 0x156   :  { %v309_v38 = vrot.slane %v307_v36, 7  ;;  %vm229_vm9 = vmor %vm227_vm8, %vm228_vm7 }
 0x157   :  { %v223_v39 = vmul.f32 %v777_v34, %v222_v37 }
 0x158   :  { %v311_v40 = vsub.f32 %v306_v33, %v309_v38 }
 0x159   :  { %v224_v41 = vmul.f32 0.5, %v223_v39 }
 0x15a   :  { %v312_v42 = vmax.f32 %v311_v40, 0.0 }
 0x15b   :  { %v225_v43 = vsub.f32 1.5, %v224_v41 }
 0x15c   :  { %v313_v44 = vadd.f32 1e-05, %v312_v42 }
 0x15d   :  { %v226_v45 = vmul.f32 %v777_v34, %v225_v43 }
 0x15e   :  { %778 = vrsqrt.f32 %v313_v44  ;;  %vm320_vm12 = vweird.f32 %v313_v44 }
 0x15f   :  { %v230_v46 = vsel %vm229_vm9, %v777_v34, %v226_v45 }
 0x160   :  { %v231_v48 = vsel %vm188_vm6, %v213_v25, %v230_v46 }
 0x161   :  { %739 = vmatmul.msk.f32.vlgmr.msra.gmra.mxu2 %vm232_vm10, %v231_v48 }
 0x162   :  { %375 = vmatpush.msra.mxu2 %v77_v47 }
 0x164   :  { %v779_v51 = vpop.eup %778  ;;  %376 = vmatpush.msra.mxu2 %v76_v49 }
 0x165   :  { %v315_v52 = vmul.f32 %v779_v51, %v313_v44  ;;  %vm321_vm11 = vweird.f32 %v779_v51 }
 0x166   :  { %377 = vmatpush.msra.mxu2 %v75_v50  ;;  %vm322_vm13 = vmor %vm320_vm12, %vm321_vm11 }
 0x167   :  { %v316_v54 = vmul.f32 %v779_v51, %v315_v52 }
 0x168   :  { %378 = vmatpush.msra.mxu2 %v74_v53 }
 0x169   :  { %v317_v55 = vmul.f32 0.5, %v316_v54 }
 0x16a   :  { %379 = vmatpush.msra.mxu2 %v73_v61 }
 0x16b   :  { %v318_v57 = vsub.f32 1.5, %v317_v55 }
 0x16c   :  { %380 = vmatpush.msra.mxu2 %v72_v62 }
 0x16d   :  { %v319_v58 = vmul.f32 %v779_v51, %v318_v57 }
 0x16e   :  { %381 = vmatpush.msra.mxu2 %v71_v0 }
 0x16f   :  { %v323_v59 = vsel %vm322_vm13, %v779_v51, %v319_v58 }
 0x170   :  { %v324_v60 = vsel %vm188_vm6, %v306_v33, %v323_v59  ;;  %382 = vmatpush.msra.mxu2 %v70_v1 }
 0x171   :  { %741 = vmatmul.msk.f32.vlgmr.msrb.gmra.mxu2 %vm232_vm10, %v324_v60 }
 0x1e4   :  { %v253_v2 = vpop.f32.mrf.mxu2 }
 0x1e5   :  { %v256_v3 = vperm.slane %v253_v2, 0  ;;  %v259_v5 = vperm.slane %v253_v2, 1 }
 0x1e7   :  { %v257_v4 = vsub.f32 %v968_v30, %v256_v3  ;;  %v258_v7 = vsub.f32 %v972_v35, %v256_v3 }
 0x1e9   :  { %v260_v6 = vmul.f32 %v259_v5, %v257_v4  ;;  %v261_v8 = vmul.f32 %v259_v5, %v258_v7 }
 0x1eb   :  { %742 = vmatmul.msk.f32.vlgmr.msra.gmra.mxu2 %vm167_vm2, %v260_v6 }
 0x1f3   :  { %743 = vmatmul.msk.f32.gmra.mxu2 %vm167_vm2, %v261_v8 }
 0x1f4   :  { %v345_v9 = vpop.f32.mrf.mxu2 }
 0x1f5   :  { %v348_v10 = vperm.slane %v345_v9, 0  ;;  %v351_v12 = vperm.slane %v345_v9, 1 }
 0x1f7   :  { %v349_v11 = vsub.f32 %v983_v56, %v348_v10  ;;  %v350_v14 = vsub.f32 %v987_v63, %v348_v10 }
 0x1f9   :  { %v352_v13 = vmul.f32 %v351_v12, %v349_v11  ;;  %v353_v30 = vmul.f32 %v351_v12, %v350_v14 }
 0x1fb   :  { %744 = vmatmul.msk.f32.gmra.mxu2 %vm167_vm2, %v352_v13 }
 0x203   :  { %745 = vmatmul.msk.f32.gmra.mxu2 %vm167_vm2, %v353_v30 }
 0x26e   :  { %v384_v16 = vpop.f32.mrf.mxu2 }
 0x26f   :  { %v385_v17 = vadd.f32 %v766_v15, %v384_v16 }
 0x271   :  { %v400_v35 = vmin.f32 %v385_v17, 0.0  ;;  %vm396_vm14 = vcmp.gt.f32.partialorder %v385_v17, 0.0 }
 0x273   :  { %v404_v18 = vmul.f32 1.442695, %v400_v35 }
 0x275   :  { %780 = vpow2.f32 %v404_v18 }
 0x276   :  { %v387_v19 = vpop.f32.mrf.mxu2 }
 0x277   :  { %v388_v20 = vadd.f32 %v766_v15, %v387_v19 }
 0x279   :  { %v401_v21 = vmin.f32 %v388_v20, 0.0  ;;  %vm397_vm15 = vcmp.gt.f32.partialorder %v388_v20, 0.0 }
 0x27b   :  { %v781_v22 = vpop.eup %780  ;;  %v406_v56 = vmul.f32 1.442695, %v401_v21 }
 0x27c   :  { %v746_v23 = vadd.f32 -1.0, %v781_v22 }
 0x27d   :  { %782 = vpow2.f32 %v406_v56 }
 0x27e   :  { %v390_v24 = vpop.f32.mrf.mxu2  ;;  %v1013_v26 = vsel %vm396_vm14, %v385_v17, %v746_v23 }
 0x27f   :  { %v391_v25 = vadd.f32 %v766_v15, %v390_v24  ;;  %v429_v31 = vmul.f32 %v1013_v26, %v1013_v26  ;;  %v420_v34 = vsel %vm167_vm2, %v1013_v26, 0.0 }
 0x281   :  { %v402_v63 = vmin.f32 %v391_v25, 0.0  ;;  %v431_v40 = vsel %vm167_vm2, %v429_v31, 0.0  ;;  %vm398_vm0 = vcmp.gt.f32.partialorder %v391_v25, 0.0 }
 0x283   :  { %v783_v27 = vpop.eup %782  ;;  %v408_v28 = vmul.f32 1.442695, %v402_v63 }
 0x284   :  { %v747_v29 = vadd.f32 -1.0, %v783_v27 }
 0x285   :  { %784 = vpow2.f32 %v408_v28  ;;  %v85_v28 = vld [vmem:[#allocation5 + $0x98] sm:$0xff] }
 0x286   :  { %v1017_v32 = vsel %vm397_vm15, %v388_v20, %v747_v29  ;;  %v393_v33 = vpop.f32.mrf.mxu2  ;;  %v84_v29 = vld [vmem:[#allocation5 + $0x90] sm:$0xff]  ;;  %625 = vmatpush.msrb.mxu1 %v85_v28 }
 0x287   :  { %v421_v36 = vsel %vm167_vm2, %v1017_v32, 0.0  ;;  %v430_v37 = vmul.f32 %v1017_v32, %v1017_v32  ;;  %v394_v38 = vadd.f32 %v766_v15, %v393_v33  ;;  %v83_v33 = vld [vmem:[#allocation5 + $0x88] sm:$0xff] }
 0x288   :  { %v422_v39 = vadd.f32 %v421_v36, %v420_v34  ;;  %626 = vmatpush.msrb.mxu1 %v84_v29 }
 0x289   :  { %v432_v41 = vsel %vm167_vm2, %v430_v37, 0.0  ;;  %v403_v42 = vmin.f32 %v394_v38, 0.0  ;;  %vm399_vm1 = vcmp.gt.f32.partialorder %v394_v38, 0.0 }
 0x28a   :  { %v423_v43 = vrot.slane %v422_v39, 4  ;;  %v433_v44 = vadd.f32 %v432_v41, %v431_v40  ;;  %627 = vmatpush.msrb.mxu1 %v83_v33 }
 0x28b   :  { %v785_v45 = vpop.eup %784  ;;  %v410_v46 = vmul.f32 1.442695, %v403_v42 }
 0x28c   :  { %v424_v47 = vadd.f32 %v423_v43, %v422_v39  ;;  %v434_v48 = vrot.slane %v433_v44, 4  ;;  %v748_v49 = vadd.f32 -1.0, %v785_v45 }
 0x28d   :  { %786 = vpow2.f32 %v410_v46 }
 0x28e   :  { %v425_v50 = vrot.slane %v424_v47, 2  ;;  %v435_v51 = vadd.f32 %v434_v48, %v433_v44  ;;  %v1027_v54 = vsel %vm398_vm0, %v391_v25, %v748_v49 }
 0x28f   :  { %v521_v61 = vmul.f32 %v1027_v54, %v1027_v54  ;;  %v512_v2 = vsel %vm167_vm2, %v1027_v54, 0.0 }
 0x290   :  { %v426_v52 = vadd.f32 %v425_v50, %v424_v47  ;;  %v436_v53 = vrot.slane %v435_v51, 2 }
 0x291   :  { %v523_v7 = vsel %vm167_vm2, %v521_v61, 0.0  ;;  %v79_v61 = vld [vmem:[#allocation5 + $0x68] sm:$0xff] }
 0x292   :  { %v427_v55 = vrot.slane %v426_v52, 1  ;;  %v437_v57 = vadd.f32 %v436_v53, %v435_v51 }
 0x293   :  { %v787_v58 = vpop.eup %786 }
 0x294   :  { %v749_v59 = vadd.f32 -1.0, %v787_v58  ;;  %v438_v60 = vrot.slane %v437_v57, 1  ;;  %v428_v0 = vadd.f32 %v427_v55, %v426_v52 }
 0x296   :  { %v1031_v62 = vsel %vm399_vm1, %v394_v38, %v749_v59  ;;  %v439_v1 = vadd.f32 %v438_v60, %v437_v57  ;;  %v82_v38 = vld [vmem:[#allocation5 + $0x80] sm:$0xff]  ;;  %v81_v59 = vld [vmem:[#allocation5 + $0x78] sm:$0xff]  ;;  %v80_v60 = vld [vmem:[#allocation5 + $0x70] sm:$0xff] }
 0x297   :  { %v513_v3 = vsel %vm167_vm2, %v1031_v62, 0.0  ;;  %v522_v4 = vmul.f32 %v1031_v62, %v1031_v62  ;;  %628 = vmatpush.msrb.mxu1 %v82_v38 }
 0x298   :  { %v514_v5 = vadd.f32 %v513_v3, %v512_v2  ;;  %v440_v6 = vsel %vm188_vm6, %v428_v0, %v439_v1  ;;  %v78_v0 = vld [vmem:[#allocation5 + $0x60] sm:$0xff] }
 0x299   :  { %v524_v8 = vsel %vm167_vm2, %v522_v4, 0.0  ;;  %750 = vmatmul.msk.f32.vlgmr.msra.gmra.mxu1 %vm167_vm2, %v440_v6 }
 0x29a   :  { %v515_v9 = vrot.slane %v514_v5, 4  ;;  %v525_v10 = vadd.f32 %v524_v8, %v523_v7  ;;  %629 = vmatpush.msrb.mxu1 %v81_v59 }
 0x29c   :  { %v516_v11 = vadd.f32 %v515_v9, %v514_v5  ;;  %v526_v12 = vrot.slane %v525_v10, 4  ;;  %630 = vmatpush.msrb.mxu1 %v80_v60 }
 0x29e   :  { %v517_v13 = vrot.slane %v516_v11, 2  ;;  %v527_v14 = vadd.f32 %v526_v12, %v525_v10  ;;  %631 = vmatpush.msrb.mxu1 %v79_v61 }
 0x2a0   :  { %v518_v30 = vadd.f32 %v517_v13, %v516_v11  ;;  %v528_v15 = vrot.slane %v527_v14, 2  ;;  %632 = vmatpush.msrb.mxu1 %v78_v0 }
 0x2a2   :  { %v519_v16 = vrot.slane %v518_v30, 1  ;;  %v529_v17 = vadd.f32 %v528_v15, %v527_v14  ;;  %v767_v14 = vld [vmem:[#allocation7 + $0x2] ss:$0 sm:$0xff] }
 0x2a4   :  { %v530_v35 = vrot.slane %v529_v17, 1  ;;  %v520_v18 = vadd.f32 %v519_v16, %v518_v30 }
 0x2a6   :  { %v531_v19 = vadd.f32 %v530_v35, %v529_v17 }
 0x2a8   :  { %v532_v20 = vsel %vm188_vm6, %v520_v18, %v531_v19 }
 0x2a9   :  { %752 = vmatmul.msk.f32.vlgmr.msrb.gmra.mxu0 %vm167_vm2, %v532_v20 }
 0x316   :  { %v461_v21 = vpop.f32.mrf.mxu1 }
 0x317   :  { %v464_v22 = vmul.f32 0.0078125, %v461_v21  ;;  %v89_v21 = vld [vmem:[#allocation7 + $0x3] sm:$0x1] }
 0x319   :  { %v465_v56 = vmul.f32 %v464_v22, %v464_v22 }
 0x31b   :  { %v467_v23 = vrot.slane %v465_v56, 7 }
 0x31d   :  { %v469_v24 = vsub.f32 %v464_v22, %v467_v23 }
 0x31f   :  { %v470_v25 = vmax.f32 %v469_v24, 0.0 }
 0x321   :  { %v471_v63 = vadd.f32 1e-05, %v470_v25  ;;  %v923_v25 = vmov 0  }
 0x323   :  { %788 = vrsqrt.f32 %v471_v63  ;;  %vm478_vm4 = vweird.f32 %v471_v63 }
 0x326   :  { %v553_v27 = vpop.f32.mrf.mxu0 }
 0x327   :  { %v556_v31 = vmul.f32 0.0078125, %v553_v27 }
 0x329   :  { %v789_v34 = vpop.eup %788  ;;  %v557_v36 = vmul.f32 %v556_v31, %v556_v31 }
 0x32a   :  { %v473_v37 = vmul.f32 %v789_v34, %v471_v63  ;;  %vm479_vm3 = vweird.f32 %v789_v34 }
 0x32b   :  { %v559_v39 = vrot.slane %v557_v36, 7  ;;  %vm480_vm5 = vmor %vm478_vm4, %vm479_vm3 }
 0x32c   :  { %v474_v40 = vmul.f32 %v789_v34, %v473_v37 }
 0x32d   :  { %v561_v41 = vsub.f32 %v556_v31, %v559_v39 }
 0x32e   :  { %v475_v42 = vmul.f32 0.5, %v474_v40 }
 0x32f   :  { %v562_v43 = vmax.f32 %v561_v41, 0.0 }
 0x330   :  { %v476_v44 = vsub.f32 1.5, %v475_v42 }
 0x331   :  { %v563_v45 = vadd.f32 1e-05, %v562_v43 }
 0x332   :  { %v477_v46 = vmul.f32 %v789_v34, %v476_v44 }
 0x333   :  { %790 = vrsqrt.f32 %v563_v45  ;;  %vm570_vm8 = vweird.f32 %v563_v45 }
 0x334   :  { %v481_v47 = vsel %vm480_vm5, %v789_v34, %v477_v46 }
 0x335   :  { %v482_v48 = vsel %vm188_vm6, %v464_v22, %v481_v47 }
 0x336   :  { %751 = vmatmul.msk.f32.vlgmr.msra.gmra.mxu3 %vm232_vm10, %v482_v48 }
 0x339   :  { %v791_v49 = vpop.eup %790 }
 0x33a   :  { %v565_v50 = vmul.f32 %v791_v49, %v563_v45  ;;  %vm571_vm7 = vweird.f32 %v791_v49 }
 0x33b   :  { %vm572_vm9 = vmor %vm570_vm8, %vm571_vm7 }
 0x33c   :  { %v566_v51 = vmul.f32 %v791_v49, %v565_v50 }
 0x33e   :  { %v567_v52 = vmul.f32 0.5, %v566_v51 }
 0x340   :  { %v568_v53 = vsub.f32 1.5, %v567_v52 }
 0x342   :  { %v569_v55 = vmul.f32 %v791_v49, %v568_v53 }
 0x344   :  { %v573_v57 = vsel %vm572_vm9, %v791_v49, %v569_v55 }
 0x345   :  { %v574_v58 = vsel %vm188_vm6, %v556_v31, %v573_v57 }
 0x346   :  { %753 = vmatmul.msk.f32.vlgmr.msrb.gmra.mxu3 %vm232_vm10, %v574_v58  ;;  %vm646_vm10 = vcmp.gt.f32.partialorder %v89_v21, 0.5 }
 0x347   :  { %v699_v28 = vsel %vm646_vm10, 1, %v923_v25 }
 0x348   :  { %v700_v34 = vperm.slane %v699_v28, 0 }
 0x34a   :  { %vm1061_vm11 = vcmp.eq.s32.totalorder %v700_v34, 1 }
 0x3b9   :  { %v503_v1 = vpop.f32.mrf.mxu3 }
 0x3ba   :  { %v506_v2 = vperm.slane %v503_v1, 0  ;;  %v509_v4 = vperm.slane %v503_v1, 1 }
 0x3bc   :  { %v507_v3 = vsub.f32 %v1013_v26, %v506_v2  ;;  %v508_v6 = vsub.f32 %v1017_v32, %v506_v2 }
 0x3be   :  { %v510_v5 = vmul.f32 %v509_v4, %v507_v3  ;;  %v511_v7 = vmul.f32 %v509_v4, %v508_v6 }
 0x3c0   :  { %754 = vmatmul.msk.f32.vlgmr.msrb.gmra.mxu1 %vm167_vm2, %v510_v5 }
 0x3c8   :  { %755 = vmatmul.msk.f32.gmra.mxu1 %vm167_vm2, %v511_v7 }
 0x3c9   :  { %v595_v8 = vpop.f32.mrf.mxu3 }
 0x3ca   :  { %v598_v9 = vperm.slane %v595_v8, 0  ;;  %v601_v11 = vperm.slane %v595_v8, 1 }
 0x3cc   :  { %v599_v10 = vsub.f32 %v1027_v54, %v598_v9  ;;  %v600_v13 = vsub.f32 %v1031_v62, %v598_v9  ;;  %v90_v54 = vld [vmem:[#allocation7 + $0x4] sm:$0x1] }
 0x3cd   :  { %vm655_vm6 = vcmp.gt.f32.partialorder %v90_v54, 0.5 }
 0x3ce   :  { %v602_v12 = vmul.f32 %v601_v11, %v599_v10  ;;  %v603_v26 = vmul.f32 %v601_v11, %v600_v13  ;;  %v692_v63 = vsel %vm655_vm6, 1, %v923_v25 }
 0x3cf   :  { %v693_v31 = vperm.slane %v692_v63, 0 }
 0x3d0   :  { %756 = vmatmul.msk.f32.gmra.mxu1 %vm167_vm2, %v602_v12 }
 0x3d8   :  { %757 = vmatmul.msk.f32.gmra.mxu1 %vm167_vm2, %v603_v26  ;;  %vm1057_vm2 = vcmp.eq.s32.totalorder %v693_v31, 1 }
 0x43d   :  { %v634_v30 = vpop.f32.mrf.mxu1 }
 0x43e   :  { %v635_v15 = vadd.f32 %v767_v14, %v634_v30 }
 0x440   :  { %v660_v32 = vand.u32 2147483647, %v635_v15  ;;  %v656_v41 = vmax.f32 %v635_v15, 0.0 }
 0x442   :  { %v664_v16 = vsub.f32 0.0, %v660_v32 }
 0x444   :  { %v668_v17 = vmul.f32 1.442695, %v664_v16 }
 0x445   :  { %v637_v35 = vpop.f32.mrf.mxu1 }
 0x446   :  { %792 = vpow2.f32 %v668_v17  ;;  %v638_v18 = vadd.f32 %v767_v14, %v637_v35 }
 0x448   :  { %v661_v19 = vand.u32 2147483647, %v638_v18  ;;  %v657_v59 = vmax.f32 %v638_v18, 0.0 }
 0x44a   :  { %v665_v20 = vsub.f32 0.0, %v661_v19 }
 0x44c   :  { %v793_v22 = vpop.eup %792  ;;  %v670_v56 = vmul.f32 1.442695, %v665_v20 }
 0x44d   :  { %v676_v62 = vadd.f32 1.0, %v793_v22  ;;  %v640_v23 = vpop.f32.mrf.mxu1 }
 0x44e   :  { %794 = vpow2.f32 %v670_v56  ;;  %v641_v24 = vadd.f32 %v767_v14, %v640_v23 }
 0x44f   :  { %796 = vlog2.f32 %v676_v62 }
 0x450   :  { %798 = vtanh.f32 %v635_v15  ;;  %v662_v27 = vand.u32 2147483647, %v641_v24  ;;  %v658_v7 = vmax.f32 %v641_v24, 0.0 }
 0x452   :  { %v666_v29 = vsub.f32 0.0, %v662_v27 }
 0x454   :  { %v795_v33 = vpop.eup %794  ;;  %v672_v36 = vmul.f32 1.442695, %v666_v29 }
 0x455   :  { %v797_v37 = vpop.eup %796  ;;  %v677_v38 = vadd.f32 1.0, %v795_v33  ;;  %v643_v39 = vpop.f32.mrf.mxu1 }
 0x456   :  { %v799_v40 = vpop.eup %798  ;;  %v681_v42 = vmul.f32 0.6931472, %v797_v37  ;;  %800 = vpow2.f32 %v672_v36  ;;  %v644_v43 = vadd.f32 %v767_v14, %v643_v39 }
 0x457   :  { %802 = vlog2.f32 %v677_v38  ;;  %v651_v48 = vmul.f32 8.8, %v799_v40 }
 0x458   :  { %v688_v45 = vadd.f32 %v681_v42, %v656_v41  ;;  %804 = vtanh.f32 %v638_v18  ;;  %v663_v47 = vand.u32 2147483647, %v644_v43  ;;  %v659_v14 = vmax.f32 %v644_v43, 0.0 }
 0x45a   :  { %v695_v49 = vsel %vm1057_vm2, %v688_v45, %v635_v15  ;;  %v667_v50 = vsub.f32 0.0, %v663_v47 }
 0x45b   :  { %v702_v51 = vsel %vm1061_vm11, %v651_v48, %v695_v49 }
 0x45c   :  { %v801_v52 = vpop.eup %800  ;;  %706 = vst [vmem:[#allocation8] sm:$0xff] %v702_v51  ;;  %v674_v53 = vmul.f32 1.442695, %v667_v50 }
 0x45d   :  { %v803_v55 = vpop.eup %802  ;;  %v678_v57 = vadd.f32 1.0, %v801_v52 }
 0x45e   :  { %v805_v58 = vpop.eup %804  ;;  %v683_v60 = vmul.f32 0.6931472, %v803_v55  ;;  %806 = vpow2.f32 %v674_v53 }
 0x45f   :  { %808 = vlog2.f32 %v678_v57  ;;  %v652_v0 = vmul.f32 8.8, %v805_v58 }
 0x460   :  { %v689_v61 = vadd.f32 %v683_v60, %v657_v59  ;;  %810 = vtanh.f32 %v641_v24 }
 0x462   :  { %v696_v1 = vsel %vm1057_vm2, %v689_v61, %v638_v18 }
 0x463   :  { %v703_v2 = vsel %vm1061_vm11, %v652_v0, %v696_v1 }
 0x464   :  { %v807_v3 = vpop.eup %806  ;;  %707 = vst [vmem:[#allocation8 + $0x8] sm:$0xff] %v703_v2 }
 0x465   :  { %v809_v4 = vpop.eup %808  ;;  %v679_v5 = vadd.f32 1.0, %v807_v3 }
 0x466   :  { %v811_v6 = vpop.eup %810  ;;  %v685_v8 = vmul.f32 0.6931472, %v809_v4 }
 0x467   :  { %812 = vlog2.f32 %v679_v5  ;;  %v653_v10 = vmul.f32 8.8, %v811_v6 }
 0x468   :  { %v690_v9 = vadd.f32 %v685_v8, %v658_v7  ;;  %814 = vtanh.f32 %v644_v43 }
 0x46a   :  { %v697_v11 = vsel %vm1057_vm2, %v690_v9, %v641_v24 }
 0x46b   :  { %v704_v12 = vsel %vm1061_vm11, %v653_v10, %v697_v11 }
 0x46c   :  { %708 = vst [vmem:[#allocation8 + $0x10] sm:$0xff] %v704_v12 }
 0x46d   :  { %v813_v13 = vpop.eup %812 }
 0x46e   :  { %v815_v26 = vpop.eup %814  ;;  %v687_v30 = vmul.f32 0.6931472, %v813_v13 }
 0x46f   :  { %v654_v32 = vmul.f32 8.8, %v815_v26 }
 0x470   :  { %v691_v15 = vadd.f32 %v687_v30, %v659_v14 }
 0x472   :  { %v698_v16 = vsel %vm1057_vm2, %v691_v15, %v644_v43 }
 0x473   :  { %v705_v17 = vsel %vm1061_vm11, %v654_v32, %v698_v16 }
 0x474   :  { %709 = vst [vmem:[#allocation8 + $0x18] sm:$0xff] %v705_v17 }
 0x475   :  { %722 = dma.vmem_to_hbm [thread:$0]  %s715_s27, 512, %s717_s30, [#allocation4], %s919_s20, %s919_s20, %s920_s21  }
 0x476   :  { %916 = dma.done.wait [#allocation4], 512  }
 0x477   :  { %917 = vsyncadd [#allocation4], 4294966784 }
 0x478   :  { %727 = vsyncpa [#allocation3], 1 }
 0x479   :  { %728 = vsyncpa [#allocation6], 1 }
 0x47a   :  { %729 = vsyncpa [#allocation4], 1 }

</bundles_post_ra>
